<compile_context>
chip_gen: v6e
topology: v6e:2x2x1
jax: 0.10.0
libtpu: 0.0.40
codegen_flags: <defaults>
</compile_context>

<pallas_src>
import math

import jax
import jax.numpy as jnp
from jax.experimental import pallas as pl
from jax.experimental.pallas import tpu as pltpu


def _round_up(x, m):
    return ((x + m - 1) // m) * m


def _cdiv(a, b):
    return -(-a // b)


# ----------------------------------------------------------------------------
# Parameter packing (done once, outside the kernel).
# ----------------------------------------------------------------------------
def prepare_params(params, compute_dtype=jnp.bfloat16):
    """Pack weights/biases into 2 lane-aligned resident buffers + static meta.

    wp  (compute dtype): w1 | w2 | [w3 | w3 @ cb^T]   (fused layer-3 RHS)
    aux (f32)          : b1 | b2 | [b3 | b3 @ cb^T] | ||c||^2   (8-row stripes)
    The exact f32 codebook is kept OUTSIDE the kernel for the wrapper-side
    gather (no f32 one-hot matmul on the MXU).
    """
    w1, w2, w3 = params["w1"], params["w2"], params["w3"]
    b1, b2, b3 = params["b1"], params["b2"], params["b3"]
    cb = params["codebook"].astype(jnp.float32)          # (K, D)

    in_dim, hid = w1.shape
    out_dim = w3.shape[1]
    k = cb.shape[0]

    in_p = _round_up(in_dim, 8)          # sublane alignment of row offsets
    hp = _round_up(hid, 128)             # lane-dense hidden width
    dp = _round_up(out_dim + 1, 128)     # +1 spare lane: idx column
    kp = _round_up(k, 128)               # lane-dense codebook width
    fw = dp + kp                         # fused layer-3 RHS width
    wl = max(hp, fw)                     # common lane width of packed buffers

    # fused layer-3 RHS / bias: cross term precomputed at highest precision
    hi = jax.lax.Precision.HIGHEST
    w3cb = jnp.dot(w3, cb.T, precision=hi)                       # (hid, k)
    b3cb = jnp.dot(b3.reshape(1, -1), cb.T, precision=hi)        # (1, k)

    # --- MXU-operand buffer (compute dtype): w1 | w2 | [w3 | w3cb] ----------
    r_w1, r_w2, r_w3 = 0, in_p, in_p + hp
    wrows = in_p + 2 * hp
    wp = jnp.zeros((wrows, wl), jnp.float32)
    wp = wp.at[r_w1:r_w1 + in_dim, :hid].set(w1)
    wp = wp.at[r_w2:r_w2 + hid, :hid].set(w2)
    wp = wp.at[r_w3:r_w3 + hid, :out_dim].set(w3)
    wp = wp.at[r_w3:r_w3 + hid, dp:dp + k].set(w3cb)
    wp = wp.astype(compute_dtype)

    # --- f32 aux buffer: biases (fused layout) + hoisted code norms ---------
    r_b1, r_b2, r_b3, r_nrm = 0, 8, 16, 24               # 8-row aligned stripes
    arows = 32
    norms = jnp.sum(cb * cb, axis=-1)
    norms = jnp.pad(norms, (0, kp - k), constant_values=1e30)  # pad codes lose
    aux = jnp.zeros((arows, wl), jnp.float32)
    aux = aux.at[r_b1, :hid].set(b1.reshape(-1))
    aux = aux.at[r_b2, :hid].set(b2.reshape(-1))
    aux = aux.at[r_b3, :out_dim].set(b3.reshape(-1))
    aux = aux.at[r_b3, dp:dp + k].set(b3cb.reshape(-1))
    aux = aux.at[r_nrm, :kp].set(norms)

    meta = dict(in_dim=in_dim, in_p=in_p, hid=hid, hp=hp, out_dim=out_dim,
                dp=dp, k=k, kp=kp, fw=fw, wl=wl,
                r_w1=r_w1, r_w2=r_w2, r_w3=r_w3,
                r_b1=r_b1, r_b2=r_b2, r_b3=r_b3, r_nrm=r_nrm,
                compute_dtype=compute_dtype)
    return {"wp": wp, "aux": aux, "codebook": cb, "meta": meta}


# ----------------------------------------------------------------------------
# Forward pass.
# ----------------------------------------------------------------------------
def vq_speaker_forward(obs, packed, *, tile_b=512):
    m = packed["meta"]
    B, in_dim = obs.shape
    assert in_dim == m["in_dim"]

    IN_P, HP, DP, KP, FW = m["in_p"], m["hp"], m["dp"], m["kp"], m["fw"]
    OUT = m["out_dim"]
    IDX_COL = OUT
    cdt = m["compute_dtype"]
    r_w1, r_w2, r_w3 = m["r_w1"], m["r_w2"], m["r_w3"]
    r_b1, r_b2, r_b3, r_nrm = m["r_b1"], m["r_b2"], m["r_b3"], m["r_nrm"]

    # --- batch tiling: always >=2 (and even) tiles so v7x megacore is fed ---
    B8 = _round_up(B, 8)
    n_tiles = max(2, _cdiv(B8, tile_b))
    n_tiles += n_tiles % 2                    # even tile count -> no straggler
    TB = _round_up(_cdiv(B8, n_tiles), 8)
    G = n_tiles
    B_pad = G * TB

    obs_p = jnp.pad(obs.astype(jnp.float32),
                    ((0, B_pad - B), (0, IN_P - in_dim)))

    def kernel(obs_ref, wp_ref, aux_ref, out_ref):
        # resident parameter views (static, aligned slices -> free)
        w1 = wp_ref[pl.ds(r_w1, IN_P), pl.ds(0, HP)]
        w2 = wp_ref[pl.ds(r_w2, HP), pl.ds(0, HP)]
        w3f = wp_ref[pl.ds(r_w3, HP), pl.ds(0, FW)]           # [w3 | w3@cb^T]
        b1 = aux_ref[pl.ds(r_b1, 1), pl.ds(0, HP)]
        b2 = aux_ref[pl.ds(r_b2, 1), pl.ds(0, HP)]
        b3f = aux_ref[pl.ds(r_b3, 1), pl.ds(0, FW)]           # [b3 | b3@cb^T]
        c_norm = aux_ref[pl.ds(r_nrm, 1), pl.ds(0, KP)]       # ||c||^2 (hoisted)

        # ---- MLP: Linear -> ReLU -> Linear -> ReLU (f32 accumulation) ------
        x = obs_ref[...].astype(cdt)                          # (TB, IN_P)
        h = jnp.maximum(
            jnp.dot(x, w1, preferred_element_type=jnp.float32) + b1, 0.0)
        h = jnp.maximum(
            jnp.dot(h.astype(cdt), w2, preferred_element_type=jnp.float32) + b2,
            0.0)

        # ---- Fused layer-3 + VQ cross term: one full-width MXU pass --------
        zf = jnp.dot(h.astype(cdt), w3f,
                     preferred_element_type=jnp.float32) + b3f  # (TB, DP+KP)
        z = zf[:, :DP]                                          # (TB, DP) f32
        cross = zf[:, DP:]                                      # (TB, KP) f32

        # ---- argmin distance: ||c||^2 - 2*z.c (||z||^2 constant per row) ---
        d = c_norm - 2.0 * cross                                # (TB, KP)
        iota_k = jax.lax.broadcasted_iota(jnp.int32, d.shape, 1)
        d_min = jnp.min(d, axis=-1, keepdims=True)
        # first index achieving the minimum (torch argmin tie-break)
        idx = jnp.min(jnp.where(d <= d_min, iota_k, KP),
                      axis=-1, keepdims=True)                   # (TB, 1) int32

        # single lane-dense f32 slab: z in lanes [0, OUT), idx in lane OUT.
        # (bf16 slab would halve HBM traffic but costs loss precision — keep f32.)
        lane = jax.lax.broadcasted_iota(jnp.int32, (z.shape[0], DP), 1)
        out_ref[...] = jnp.where(lane == IDX_COL, idx.astype(jnp.float32), z)

    slab = pl.pallas_call(
        kernel,
        out_shape=jax.ShapeDtypeStruct((B_pad, DP), jnp.float32),
        grid=(G,),
        in_specs=[
            pl.BlockSpec((TB, IN_P), lambda i: (i, 0)),            # streamed
            pl.BlockSpec(packed["wp"].shape, lambda i: (0, 0),
                         pipeline_mode=pl.Buffered(1)),            # resident
            pl.BlockSpec(packed["aux"].shape, lambda i: (0, 0),
                         pipeline_mode=pl.Buffered(1)),            # resident
        ],
        out_specs=pl.BlockSpec((TB, DP), lambda i: (i, 0)),
        compiler_params=pltpu.CompilerParams(
            dimension_semantics=("parallel",),
            vmem_limit_bytes=32 * 1024 * 1024),
    )(obs_p, packed["wp"], packed["aux"])

    z = slab[:B, :OUT]
    idx = slab[:B, IDX_COL].astype(jnp.int32)
    # exact f32 codebook gather (straight-through msg) + commitment loss
    msg = packed["codebook"][idx]
    cmt_loss = jnp.mean((msg - z) ** 2)            # commitment_weight = 1.0
    return msg, idx, cmt_loss


# ----------------------------------------------------------------------------
# Init (matches MLPNetwork.init: xavier_uniform(gain=relu), bias=0.01) + ref.
# ----------------------------------------------------------------------------
def _xavier_uniform(key, fan_in, fan_out, gain):
    bound = gain * math.sqrt(6.0 / (fan_in + fan_out))
    return jax.random.uniform(key, (fan_in, fan_out), jnp.float32, -bound, bound)


def init_params(key, in_dim, out_dim, hidden_dim=64, codebook_size=128):
    gain = math.sqrt(2.0)  # nn.init.calculate_gain('relu')
    k1, k2, k3, k4 = jax.random.split(key, 4)
    return {
        "w1": _xavier_uniform(k1, in_dim, hidden_dim, gain),
        "b1": jnp.full((1, hidden_dim), 0.01, jnp.float32),
        "w2": _xavier_uniform(k2, hidden_dim, hidden_dim, gain),
        "b2": jnp.full((1, hidden_dim), 0.01, jnp.float32),
        "w3": _xavier_uniform(k3, hidden_dim, out_dim, gain),
        "b3": jnp.full((1, out_dim), 0.01, jnp.float32),
        "codebook": jax.random.normal(k4, (codebook_size, out_dim), jnp.float32),
    }


def vq_speaker_reference(obs, params):
    """Pure-JAX f32 reference (highest matmul precision)."""
    hi = jax.lax.Precision.HIGHEST
    h = jnp.maximum(jnp.dot(obs, params["w1"], precision=hi) + params["b1"], 0.0)
    h = jnp.maximum(jnp.dot(h, params["w2"], precision=hi) + params["b2"], 0.0)
    z = jnp.dot(h, params["w3"], precision=hi) + params["b3"]
    cb = params["codebook"]
    d = (jnp.sum(z * z, axis=-1, keepdims=True)
         - 2.0 * jnp.dot(z, cb.T, precision=hi)
         + jnp.sum(cb * cb, axis=-1)[None, :])
    idx = jnp.argmin(d, axis=-1).astype(jnp.int32)
    q = cb[idx]
    cmt = jnp.mean((q - z) ** 2)
    return q, idx, cmt


if __name__ == "__main__":
    B, IN_DIM, OUT_DIM, HIDDEN, K = 8, 16, 32, 64, 128

    key = jax.random.PRNGKey(0)
    k_obs, k_params = jax.random.split(key)
    obs = jax.random.normal(k_obs, (B, IN_DIM), jnp.float32)
    params = init_params(k_params, IN_DIM, OUT_DIM, hidden_dim=HIDDEN,
                         codebook_size=K)

    # --- exact-parity path (f32 MXU operands, TEST-ONLY) vs. the reference --
    # (near-tie argmins could in principle flip under the fused cross term;
    #  astronomically unlikely for random Gaussian data at this seed/size.)
    packed_f32 = prepare_params(params, compute_dtype=jnp.float32)
    msg, idx, cmt_loss = vq_speaker_forward(obs, packed_f32)
    jax.block_until_ready((msg, idx, cmt_loss))

    assert msg.shape == (B, OUT_DIM) and msg.dtype == jnp.float32
    assert idx.shape == (B,) and idx.dtype == jnp.int32
    assert cmt_loss.shape == () and cmt_loss.dtype == jnp.float32

    r_msg, r_idx, r_cmt = vq_speaker_reference(obs, params)
    assert bool(jnp.all(idx == r_idx))
    assert bool(jnp.allclose(msg, r_msg, atol=1e-3, rtol=1e-3))
    assert bool(jnp.allclose(cmt_loss, r_cmt, atol=1e-3, rtol=1e-3))

    # --- fast path: bf16 MXU operands (v6e/v7x-native); f32 accumulation,
    #     f32 argmin, exact f32 codebook gather & loss in the wrapper --------
    packed_bf16 = prepare_params(params, compute_dtype=jnp.bfloat16)
    msg16, idx16, cmt16 = vq_speaker_forward(obs, packed_bf16)
    jax.block_until_ready((msg16, idx16, cmt16))
    assert msg16.shape == (B, OUT_DIM) and idx16.shape == (B,)
    assert bool(jnp.all((idx16 >= 0) & (idx16 < K)))

    print("KERNEL_OK")
</pallas_src>

<mosaic_0001>
module attributes {stable_mosaic.version = 11 : i64} {
  func.func @kernel(%arg0: i32, %arg1: memref<8x16xf32, #tpu.memory_space<vmem>>, %arg2: memref<272x256xf32, #tpu.memory_space<vmem>>, %arg3: memref<32x256xf32, #tpu.memory_space<vmem>>, %arg4: memref<8x128xf32, #tpu.memory_space<vmem>>) attributes {dimension_semantics = [#tpu.dimension_semantics<parallel>], iteration_bounds = array<i64: 2>, scalar_prefetch = 0 : i64, scratch_operands = 0 : i64, tpu.core_type = #tpu.core_type<tc>, window_params = [{transform_indices = @transform_0, window_bounds = array<i64: 8, 16>}, {pipeline_mode = #tpu.pipeline_mode<synchronous>, transform_indices = @transform_1, window_bounds = array<i64: 272, 256>}, {pipeline_mode = #tpu.pipeline_mode<synchronous>, transform_indices = @transform_2, window_bounds = array<i64: 32, 256>}, {transform_indices = @transform_3, window_bounds = array<i64: 8, 128>}]} {
    %c0 = arith.constant 0 : index
    %c0_0 = arith.constant 0 : index
    %0 = vector.load %arg2[%c0, %c0_0] : memref<272x256xf32, #tpu.memory_space<vmem>>, vector<16x128xf32>
    %c16 = arith.constant 16 : index
    %c0_1 = arith.constant 0 : index
    %1 = vector.load %arg2[%c16, %c0_1] : memref<272x256xf32, #tpu.memory_space<vmem>>, vector<128x128xf32>
    %c144 = arith.constant 144 : index
    %c0_2 = arith.constant 0 : index
    %2 = vector.load %arg2[%c144, %c0_2] : memref<272x256xf32, #tpu.memory_space<vmem>>, vector<128x256xf32>
    %c0_3 = arith.constant 0 : index
    %c0_4 = arith.constant 0 : index
    %3 = vector.load %arg3[%c0_3, %c0_4] : memref<32x256xf32, #tpu.memory_space<vmem>>, vector<1x128xf32>
    %c8 = arith.constant 8 : index
    %c0_5 = arith.constant 0 : index
    %4 = vector.load %arg3[%c8, %c0_5] : memref<32x256xf32, #tpu.memory_space<vmem>>, vector<1x128xf32>
    %c16_6 = arith.constant 16 : index
    %c0_7 = arith.constant 0 : index
    %5 = vector.load %arg3[%c16_6, %c0_7] : memref<32x256xf32, #tpu.memory_space<vmem>>, vector<1x256xf32>
    %c24 = arith.constant 24 : index
    %c0_8 = arith.constant 0 : index
    %6 = vector.load %arg3[%c24, %c0_8] : memref<32x256xf32, #tpu.memory_space<vmem>>, vector<1x128xf32>
    %c0_9 = arith.constant 0 : index
    %c0_10 = arith.constant 0 : index
    %7 = vector.load %arg1[%c0_9, %c0_10] : memref<8x16xf32, #tpu.memory_space<vmem>>, vector<8x16xf32>
    %cst = arith.constant dense<0.000000e+00> : vector<8x128xf32>
    %8 = tpu.matmul %7, %0, %cst {dimension_numbers = #tpu.dot_dimension_numbers<[1], [0], [0], [1], [0, 0, 1, 1], [], []>} : vector<8x16xf32>, vector<16x128xf32>, vector<8x128xf32> -> vector<8x128xf32>
    %9 = vector.broadcast %3 : vector<1x128xf32> to vector<8x128xf32>
    %10 = arith.addf %8, %9 : vector<8x128xf32>
    %cst_11 = arith.constant 0.000000e+00 : f32
    %11 = vector.broadcast %cst_11 : f32 to vector<8x128xf32>
    %12 = arith.maximumf %10, %11 : vector<8x128xf32>
    %cst_12 = arith.constant dense<0.000000e+00> : vector<8x128xf32>
    %13 = tpu.matmul %12, %1, %cst_12 {dimension_numbers = #tpu.dot_dimension_numbers<[1], [0], [0], [1], [0, 0, 1, 1], [], []>} : vector<8x128xf32>, vector<128x128xf32>, vector<8x128xf32> -> vector<8x128xf32>
    %14 = vector.broadcast %4 : vector<1x128xf32> to vector<8x128xf32>
    %15 = arith.addf %13, %14 : vector<8x128xf32>
    %cst_13 = arith.constant 0.000000e+00 : f32
    %16 = vector.broadcast %cst_13 : f32 to vector<8x128xf32>
    %17 = arith.maximumf %15, %16 : vector<8x128xf32>
    %cst_14 = arith.constant dense<0.000000e+00> : vector<8x256xf32>
    %18 = tpu.matmul %17, %2, %cst_14 {dimension_numbers = #tpu.dot_dimension_numbers<[1], [0], [0], [1], [0, 0, 1, 1], [], []>} : vector<8x128xf32>, vector<128x256xf32>, vector<8x256xf32> -> vector<8x256xf32>
    %19 = vector.broadcast %5 : vector<1x256xf32> to vector<8x256xf32>
    %20 = arith.addf %18, %19 : vector<8x256xf32>
    %21 = vector.extract_strided_slice %20 {offsets = [0, 0], sizes = [8, 128], strides = [1, 1]} : vector<8x256xf32> to vector<8x128xf32>
    %22 = vector.extract_strided_slice %20 {offsets = [0, 128], sizes = [8, 128], strides = [1, 1]} : vector<8x256xf32> to vector<8x128xf32>
    %cst_15 = arith.constant 2.000000e+00 : f32
    %23 = vector.broadcast %cst_15 : f32 to vector<8x128xf32>
    %24 = arith.mulf %23, %22 : vector<8x128xf32>
    %25 = vector.broadcast %6 : vector<1x128xf32> to vector<8x128xf32>
    %26 = arith.subf %25, %24 : vector<8x128xf32>
    %27 = tpu.iota {dimensions = array<i32: 1>} : vector<8x128xi32>
    %cst_16 = arith.constant dense<0x7F800000> : vector<8xf32>
    %28 = vector.multi_reduction <minimumf>, %26, %cst_16 [1] : vector<8x128xf32> to vector<8xf32>
    %29 = vector.shape_cast %28 : vector<8xf32> to vector<8x1xf32>
    %30 = vector.broadcast %29 : vector<8x1xf32> to vector<8x128xf32>
    %31 = arith.cmpf ole, %26, %30 : vector<8x128xf32>
    %c128_i32 = arith.constant 128 : i32
    %32 = vector.broadcast %c128_i32 : i32 to vector<8x128xi32>
    %33 = arith.select %31, %27, %32 : vector<8x128xi1>, vector<8x128xi32>
    %cst_17 = arith.constant dense<2147483647> : vector<8xi32>
    %34 = vector.multi_reduction <minsi>, %33, %cst_17 [1] : vector<8x128xi32> to vector<8xi32>
    %35 = vector.shape_cast %34 : vector<8xi32> to vector<8x1xi32>
    %36 = tpu.iota {dimensions = array<i32: 1>} : vector<8x128xi32>
    %c32_i32 = arith.constant 32 : i32
    %37 = vector.broadcast %c32_i32 : i32 to vector<8x128xi32>
    %38 = arith.cmpi eq, %36, %37 : vector<8x128xi32>
    %39 = arith.sitofp %35 : vector<8x1xi32> to vector<8x1xf32>
    %40 = vector.shape_cast %39 : vector<8x1xf32> to vector<8x1xf32>
    %41 = vector.broadcast %40 : vector<8x1xf32> to vector<8x128xf32>
    %42 = arith.select %38, %41, %21 : vector<8x128xi1>, vector<8x128xf32>
    %c0_18 = arith.constant 0 : index
    %c0_19 = arith.constant 0 : index
    %43 = vector.load %arg4[%c0_18, %c0_19] : memref<8x128xf32, #tpu.memory_space<vmem>>, vector<8x128xf32>
    tpu.vector_store %arg4[%c0_18, %c0_19], %42 {strides = array<i32>} : memref<8x128xf32, #tpu.memory_space<vmem>>, vector<8x128xf32>,
    return
  }
  func.func @transform_0(%arg0: i32) -> (i32, i32) {
    %c0_i32 = arith.constant 0 : i32
    %c0_i32_0 = arith.constant 0 : i32
    return %arg0, %c0_i32 : i32, i32
  }
  func.func @transform_1(%arg0: i32) -> (i32, i32) {
    %c0_i32 = arith.constant 0 : i32
    %c0_i32_0 = arith.constant 0 : i32
    %c0_i32_1 = arith.constant 0 : i32
    return %c0_i32, %c0_i32_0 : i32, i32
  }
  func.func @transform_2(%arg0: i32) -> (i32, i32) {
    %c0_i32 = arith.constant 0 : i32
    %c0_i32_0 = arith.constant 0 : i32
    %c0_i32_1 = arith.constant 0 : i32
    return %c0_i32, %c0_i32_0 : i32, i32
  }
  func.func @transform_3(%arg0: i32) -> (i32, i32) {
    %c0_i32 = arith.constant 0 : i32
    %c0_i32_0 = arith.constant 0 : i32
    return %arg0, %c0_i32 : i32, i32
  }
}

</mosaic_0001>

<bundles_post_ra>
// kernel: tpu_custom_call.1
= control target key start
LH: loop header
LB: loop body
LE: loop exit
PB: predicated region body
PF: predicated region fallthrough
CT: control target
= control target key end

     0   :  { %8 = vsyncpa [#allocation3], 0  ;;  %s1131_s0 = inlined_call_operand.hbm [shape: f32[16,16], index: 0, kind: input, shape index: {}]   ;;  %s1132_s1 = inlined_call_operand.hbm [shape: f32[272,256], index: 1, kind: input, shape index: {}]   ;;  %s1133_s2 = inlined_call_operand.hbm [shape: f32[32,256], index: 2, kind: input, shape index: {}]   ;;  %s1134_s3 = inlined_call_operand.hbm [shape: f32[16,128], index: 3, kind: output, shape index: {}]  }
   0x1   :  { %10 = vsyncpa [#allocation3 + $0x1], 0 }
   0x2   :  { %11 = vsyncpa [#allocation6], 0 }
   0x3   :  { %12 = vsyncpa [#allocation4], 0 }
   0x4   :  { %14 = vsyncpa [#allocation4 + $0x1], 0  ;;  %s956_s12 = smov 0   ;;  %s958_s13 = smov 0  }
   0x5   :  { %s960_s14 = smov 0   ;;  %s962_s15 = smov 0  }
   0x6 LB: > { %s977_s16 = sadd.s32 4294967295, %s926_s15   ;;  %s628_s17 = sadd.s32 4294967294, %s926_s15   ;;  %s926_s15 = sphi %s962_s15, %s1156_s15   ;;  %s922_s14 = sphi %s960_s14, %s1155_s14   ;;  %s918_s13 = sphi %s958_s13, %s1154_s13   ;;  %s914_s12 = sphi %s956_s12, %s1153_s12  }
   0x7   : > { %p40_p0 = scmp.ne.s32.totalorder %s918_s13, %s914_s12  ;;  %p1135_p1 = scmp.eq.s32.totalorder %s977_s16, 0 }
   0x8   : > { %p112_p3 = scmp.eq.s32.totalorder %s628_s17, 1  ;;  %p629_p5 = scmp.ge.s32.totalorder %s926_s15, 1 }
   0x9   : > { %p986_p4 = por %p1135_p1, %p40_p0  ;;  %p119_p7 = scmp.lt.s32.totalorder %s926_s15, 3 }
   0xa   : > { %p991_p6 = por %p112_p3, %p40_p0  ;;  %s928_s21 = smov [#allocation5]  }
   0xb   : > { %s1139_s18 = scalar_select %p986_p4, 1, 0 }
   0xc   : > { %s1140_s19 = scalar_select %p991_p6, 1, 0 }
   0xd   : > { %p996_p8 = pnand %p629_p5, %p119_p7  ;;  %s131_s22 = sshll.u32 %s928_s21, 4  ;;  %s132_s22 = int_to_ptr.vmem [resolvable:$true] %s131_s22 }
   0xe   : > { %s929_s24 = smov [#allocation7]   ;;  %s789_s26 = scalar_lea.vmem %s132_s22, 8704 }
   0xf   : > { %s1141_s20 = scalar_select %p996_p8, 1, 0 }
  0x10   : > { %p719_p9 = pneg %p996_p8  ;;  %s144_s25 = sshll.u32 %s929_s24, 4  ;;  %s145_s25 = int_to_ptr.vmem [resolvable:$true] %s144_s25 }
  0x11   : > { %p790_p13 = scmp.ne.s32.totalorder %s132_s22, %s789_s26  ;;  %p797_p5 = scmp.lt.s32.totalorder %s132_s22, %s132_s22 }
  0x12   : > { %p1005_p11 = pnand %p719_p9, %p1135_p1  ;;  %p798_p7 = scmp.lt.s32.totalorder %s789_s26, %s789_s26 }
  0x14   : > { %p780_p12 = pneg %p1005_p11  ;;  %p799_p10 = por %p798_p7, %p797_p5 }
  0x16   : > { %p792_p0 = pnand %p790_p13, %p780_p12 }
  0x18   : > { %p793_p3 = pneg %p792_p0 }
  0x1a   : > { %p800_p9 = pnand %p799_p10, %p793_p3 }
  0x1c   : > { %803 = shalt.err (!%p800_p9)
}
  0x1d   : > { %s930_s27 = smov 256   ;;  %s931_s28 = smov 16  }
  0x1e   : > { %722 = dma.hbm_to_vmem [thread:$0]  (!%p1005_p11), %s1132_s1, 8704, %s132_s22, [#allocation6], %s930_s27, %s930_s27, %s931_s28  }
  0x1f   : > { %s815_s4 = scalar_lea.vmem %s145_s25, 1024  ;;  %p823_p2 = scmp.lt.s32.totalorder %s145_s25, %s145_s25 }
  0x20   : > { %p816_p1 = scmp.ne.s32.totalorder %s145_s25, %s815_s4  ;;  %p824_p6 = scmp.lt.s32.totalorder %s815_s4, %s815_s4 }
  0x22   : > { %p818_p13 = pnand %p816_p1, %p780_p12  ;;  %p825_p5 = por %p824_p6, %p823_p2 }
  0x24   : > { %p819_p0 = pneg %p818_p13 }
  0x26   : > { %p826_p10 = pnand %p825_p5, %p819_p0 }
  0x28   : > { %829 = shalt.err (!%p826_p10)
}
  0x29   : > { %725 = dma.hbm_to_vmem [thread:$0]  (!%p1005_p11), %s1133_s2, 1024, %s145_s25, [#allocation6], %s930_s27, %s930_s27, %s931_s28  }
  0x2a   : > { %s1028_s7 = sadd.s32 1, %s926_s15   ;;  %s27_s8 = sadd.s32 1, %s922_s14 }
  0x2b   : > { %s24_s9 = ssub.s32 %s926_s15, %s1028_s7  ;;  %p34_p1 = scmp.ne.s32.totalorder %s922_s14, %s918_s13 }
  0x2c   : > { %p25_p2 = scmp.eq.s32.totalorder %s24_s9, 0  ;;  %p35_p6 = scmp.eq.s32.totalorder %s926_s15, 0 }
  0x2d   : > { %p1143_p12 = scmp.eq.s32.totalorder %s977_s16, 1  ;;  %p736_p7 = scmp.lt.s32.totalorder %s926_s15, 2 }
  0x2e   : > { %s1044_s11 = scalar_select %p25_p2, %s922_s14, %s27_s8  }
  0x2f   : > { %p1038_p3 = por %p1143_p12, %p34_p1  ;;  %p36_p9 = por %p35_p6, %p34_p1 }
  0x30   : > { %s158_s17 = sand.u32 1, %s922_s14   ;;  %s634_s22 = sshll.u32 %s926_s15, 7 }
  0x31   : > { %s1144_s10 = scalar_select %p1038_p3, 1, 0 }
  0x32   : > { %s633_s21 = sshll.u32 %s158_s17, 3  ;;  %s1051_s25 = scalar_lea.hbm %s1131_s0, %s634_s22 }
  0x33   : > { %s162_s26 = scalar_lea.vmem [#allocation2], %s633_s21  ;;  %p1053_p11 = pnand %p736_p7, %p36_p9 }
  0x34   : > { %s169_s27 = sshll.u32 %s162_s26, 4  ;;  %s159_s29 = scalar_lea.sflag [#allocation3], %s158_s17  ;;  %s170_s27 = int_to_ptr.vmem [resolvable:$true] %s169_s27 }
  0x35   : > { %s830_s30 = scalar_lea.hbm %s1051_s25, 128  ;;  %p832_p0 = pneg %p1053_p11 }
  0x36   : > { %p831_p13 = scmp.ne.s32.totalorder %s1051_s25, %s830_s30  ;;  %s835_s6 = scalar_lea.hbm %s1131_s0, 256 }
  0x37   : > { %p836_p1 = scmp.lt.s32.totalorder %s1051_s25, %s1131_s0  ;;  %p837_p2 = scmp.lt.s32.totalorder %s835_s6, %s830_s30 }
  0x38   : > { %p833_p5 = pnand %p832_p0, %p831_p13 }
  0x39   : > { %p838_p6 = por %p837_p2, %p836_p1 }
  0x3a   : > { %p834_p10 = pneg %p833_p5 }
  0x3c   : > { %p839_p12 = pnand %p838_p6, %p834_p10 }
  0x3e   : > { %842 = shalt.err (!%p839_p12)
}
  0x3f   : > { %s843_s21 = scalar_lea.vmem %s170_s27, 128  ;;  %s932_s17 = smov [#allocation2]  }
  0x40   : > { %p844_p7 = scmp.ne.s32.totalorder %s170_s27, %s843_s21  ;;  %s848_s22 = sshll.u32 %s932_s17, 4  ;;  %s849_s22 = int_to_ptr.vmem [resolvable:$false] %s848_s22 }
  0x41   : > { %s850_s23 = scalar_lea.vmem %s849_s22, 256  ;;  %p851_p13 = scmp.lt.s32.totalorder %s170_s27, %s849_s22 }
  0x42   : > { %p846_p9 = pnand %p844_p7, %p832_p0  ;;  %p852_p5 = scmp.lt.s32.totalorder %s850_s23, %s843_s21 }
  0x44   : > { %p847_p3 = pneg %p846_p9  ;;  %p853_p4 = por %p852_p5, %p851_p13 }
  0x46   : > { %p854_p8 = pnand %p853_p4, %p847_p3 }
  0x48   : > { %857 = shalt.err (!%p854_p8)
}
  0x49   : > { %729 = dma.hbm_to_vmem [thread:$0]  (!%p1053_p11), %s1051_s25, 128, %s170_s27, %s159_s29  }
  0x4a   : > { %p1146_p10 = scmp.ne.s32.totalorder %s1141_s20, 0 }
  0x4b   : > { %s1074_s24 = sand.u32 (!%p1146_p10), 1, %s918_s13   ;;  %p1147_p4 = scmp.ne.s32.totalorder (!%p1146_p10), %s1139_s18, 0 }
  0x4c   : > { %178 = sbr.rel (%p1146_p10) target bundleno = 1128 (0x468), region = 32  ;;  %s636_s26 = sshll.u32 (!%p1146_p10), %s1074_s24, 3 }
  0x4d   : > { %s181_s30 = scalar_lea.sflag (!%p1146_p10), [#allocation3], %s1074_s24  ;;  %s184_s4 = scalar_lea.vmem (!%p1146_p10), [#allocation2], %s636_s26 }
  0x51   : > { %901 = dma.done.wait (%p1147_p4), %s181_s30, 128  }
  0x52   : > { %903 = vsyncadd (%p1147_p4), %s181_s30, 4294967168  ;;  %p1148_p8 = scmp.eq.s32.totalorder %s977_s16, 0 }
  0x54   : > { %905 = dma.done.wait (%p1148_p8), [#allocation6], 9728   ;;  %p1149_p3 = pmov %p1148_p8 }
  0x55   : > { %v933_v0 = vmov 0.0   ;;  %vm934_vm0 = vmmov 0   ;;  %v216_v1 = vld [vmem:[#allocation5 + $0x10] sm:$0xff]  ;;  %v215_v2 = vld [vmem:[#allocation5] sm:$0xff]  ;;  %vm271_vm1 = vcmask 130048   ;;  %v264_v20 = vld [vmem:[#allocation5 + $0x218] sm:$0xff]  ;;  %v418_v62 = vlaneseq }
  0x56   : > { %907 = vsyncadd (%p1149_p3), [#allocation6], 4294957568  ;;  %665 = vmatprep.subr.mxu0 %v933_v0  ;;  %669 = vmatprep.mubr.msk.f32.mxu0 %vm934_vm0, %v933_v0  ;;  %v270_v3 = vld [vmem:[%s184_s4] sm:$0xff]  ;;  %v231_v5 = vld [vmem:[#allocation5 + $0x100] sm:$0xff]  ;;  %s642_s18 = sshll.u32 %s977_s16, 7  ;;  %s214_s20 = scalar_lea.vmem [#allocation8], %s636_s26 }
  0x57   : > { %672 = vmatprep.subr.mxu1 %v933_v0  ;;  %704 = vmatprep.mubr.msk.f32.mxu1 %vm934_vm0, %v933_v0  ;;  %v232_v4 = vld [vmem:[#allocation5 + $0x110] sm:$0xff]  ;;  %v229_v7 = vld [vmem:[#allocation5 + $0xe0] sm:$0xff]  ;;  %v262_v22 = vld [vmem:[#allocation5 + $0x208] sm:$0xff]  ;;  %v419_v63 = vshrl.u32 %v418_v62, 7  ;;  %s539_s25 = sshll.u32 %s214_s20, 4  ;;  %s1094_s29 = scalar_lea.hbm %s1134_s3, %s642_s18  ;;  %s540_s25 = int_to_ptr.vmem [resolvable:$true] %s539_s25 }
  0x58   : > { %666 = vmatpush3.msra.mxu0 %v216_v1  ;;  %673 = vmatpush3.msra.mxu1 %v232_v4  ;;  %v230_v6 = vld [vmem:[#allocation5 + $0xf0] sm:$0xff]  ;;  %v227_v9 = vld [vmem:[#allocation5 + $0xc0] sm:$0xff]  ;;  %v260_v24 = vld [vmem:[#allocation5 + $0x1f8] sm:$0xff]  ;;  %s526_s5 = scalar_lea.sflag [#allocation4], %s1074_s24  ;;  %s858_s6 = scalar_lea.vmem %s540_s25, 128 }
  0x59   : > { %667 = vmatprep.subr.mxu0 %v933_v0  ;;  %674 = vmatprep.subr.mxu1 %v933_v0  ;;  %v228_v8 = vld [vmem:[#allocation5 + $0xd0] sm:$0xff]  ;;  %v225_v11 = vld [vmem:[#allocation5 + $0xa0] sm:$0xff]  ;;  %v258_v26 = vld [vmem:[#allocation5 + $0x1e8] sm:$0xff]  ;;  %p859_p11 = scmp.ne.s32.totalorder %s540_s25, %s858_s6  ;;  %p1150_p0 = scmp.ne.s32.totalorder %s1144_s10, 0 }
  0x5a   : > { %668 = vmatpush3.msra.mxu0 %v215_v2  ;;  %675 = vmatpush3.msra.mxu1 %v231_v5  ;;  %v226_v10 = vld [vmem:[#allocation5 + $0xb0] sm:$0xff]  ;;  %v223_v13 = vld [vmem:[#allocation5 + $0x80] sm:$0xff]  ;;  %v256_v28 = vld [vmem:[#allocation5 + $0x1d8] sm:$0xff]  ;;  %s935_s16 = smov [#allocation8]  }
  0x5b   : > { %670 = vmatmul.mubr.msk.f32.vlgmr.msra.gmra.mxu0 %vm271_vm1, %v270_v3  ;;  %676 = vmatprep.subr.mxu1 %v933_v0  ;;  %v224_v12 = vld [vmem:[#allocation5 + $0x90] sm:$0xff]  ;;  %v221_v15 = vld [vmem:[#allocation5 + $0x60] sm:$0xff]  ;;  %v254_v30 = vld [vmem:[#allocation5 + $0x1c8] sm:$0xff]  ;;  %p860_p1 = pnand %p859_p11, %p1150_p0  ;;  %s862_s8 = sshll.u32 %s935_s16, 4  ;;  %s863_s8 = int_to_ptr.vmem [resolvable:$false] %s862_s8 }
  0x5c   : > { %492 = vmatprep.mubr.f32.mxu0 %v933_v0  ;;  %677 = vmatpush3.msra.mxu1 %v230_v6  ;;  %v222_v14 = vld [vmem:[#allocation5 + $0x70] sm:$0xff]  ;;  %v219_v17 = vld [vmem:[#allocation5 + $0x40] sm:$0xff]  ;;  %v252_v32 = vld [vmem:[#allocation5 + $0x1b8] sm:$0xff]  ;;  %s864_s9 = scalar_lea.vmem %s863_s8, 256  ;;  %p865_p6 = scmp.lt.s32.totalorder %s540_s25, %s863_s8 }
  0x5d   : > { %678 = vmatprep.subr.mxu1 %v933_v0  ;;  %v220_v16 = vld [vmem:[#allocation5 + $0x50] sm:$0xff]  ;;  %v217_v19 = vld [vmem:[#allocation5 + $0x20] sm:$0xff]  ;;  %428 = vmatprep.subr.mxu0 %v264_v20  ;;  %v250_v34 = vld [vmem:[#allocation5 + $0x1a8] sm:$0xff]  ;;  %p861_p2 = pneg %p860_p1  ;;  %p866_p12 = scmp.lt.s32.totalorder %s864_s9, %s858_s6 }
  0x5e   : > { %679 = vmatpush3.msra.mxu1 %v229_v7  ;;  %v218_v18 = vld [vmem:[#allocation5 + $0x30] sm:$0xff]  ;;  %v261_v23 = vld [vmem:[#allocation5 + $0x200] sm:$0xff]  ;;  %v248_v36 = vld [vmem:[#allocation5 + $0x198] sm:$0xff] }
  0x5f   : > { %680 = vmatprep.subr.mxu1 %v933_v0  ;;  %v263_v21 = vld [vmem:[#allocation5 + $0x210] sm:$0xff]  ;;  %v257_v27 = vld [vmem:[#allocation5 + $0x1e0] sm:$0xff]  ;;  %v246_v38 = vld [vmem:[#allocation5 + $0x188] sm:$0xff]  ;;  %p867_p7 = por %p866_p12, %p865_p6 }
  0x60   : > { %681 = vmatpush3.msra.mxu1 %v228_v8  ;;  %429 = vmatpush1.msra.mxu0 %v263_v21  ;;  %v259_v25 = vld [vmem:[#allocation5 + $0x1f0] sm:$0xff]  ;;  %v253_v31 = vld [vmem:[#allocation5 + $0x1c0] sm:$0xff]  ;;  %v244_v40 = vld [vmem:[#allocation5 + $0x178] sm:$0xff] }
  0x61   : > { %682 = vmatprep.subr.mxu1 %v933_v0  ;;  %430 = vmatprep.subr.mxu0 %v262_v22  ;;  %v255_v29 = vld [vmem:[#allocation5 + $0x1d0] sm:$0xff]  ;;  %v249_v35 = vld [vmem:[#allocation5 + $0x1a0] sm:$0xff]  ;;  %v242_v42 = vld [vmem:[#allocation5 + $0x168] sm:$0xff]  ;;  %p868_p9 = pnand %p867_p7, %p861_p2 }
  0x62   : > { %683 = vmatpush3.msra.mxu1 %v227_v9  ;;  %431 = vmatpush1.msra.mxu0 %v261_v23  ;;  %v251_v33 = vld [vmem:[#allocation5 + $0x1b0] sm:$0xff]  ;;  %v245_v39 = vld [vmem:[#allocation5 + $0x180] sm:$0xff]  ;;  %v240_v44 = vld [vmem:[#allocation5 + $0x158] sm:$0xff]  ;;  %v502_v9 = vand.u32 127, %v418_v62 }
  0x63   : > { %684 = vmatprep.subr.mxu1 %v933_v0  ;;  %432 = vmatprep.subr.mxu0 %v260_v24  ;;  %v247_v37 = vld [vmem:[#allocation5 + $0x190] sm:$0xff]  ;;  %v241_v43 = vld [vmem:[#allocation5 + $0x160] sm:$0xff]  ;;  %v238_v46 = vld [vmem:[#allocation5 + $0x148] sm:$0xff] }
  0x64   : > { %685 = vmatpush3.msra.mxu1 %v226_v10  ;;  %433 = vmatpush1.msra.mxu0 %v259_v25  ;;  %v243_v41 = vld [vmem:[#allocation5 + $0x170] sm:$0xff]  ;;  %v265_v47 = vld [vmem:[#allocation7] ss:$0 sm:$0xff]  ;;  %v236_v53 = vld [vmem:[#allocation5 + $0x138] sm:$0xff]  ;;  %vm521_vm4 = vcmp.eq.s32.totalorder %v502_v9, 32 }
  0x65   : > { %686 = vmatprep.subr.mxu1 %v933_v0  ;;  %434 = vmatprep.subr.mxu0 %v258_v26  ;;  %v239_v45 = vld [vmem:[#allocation5 + $0x150] sm:$0xff]  ;;  %v237_v52 = vld [vmem:[#allocation5 + $0x140] sm:$0xff]  ;;  %v234_v55 = vld [vmem:[#allocation5 + $0x128] sm:$0xff] }
  0x66   : > { %687 = vmatpush3.msra.mxu1 %v225_v11  ;;  %435 = vmatpush1.msra.mxu0 %v257_v27  ;;  %v235_v54 = vld [vmem:[#allocation5 + $0x130] sm:$0xff]  ;;  %v233_v56 = vld [vmem:[#allocation5 + $0x120] sm:$0xff] }
  0x67   : > { %688 = vmatprep.subr.mxu1 %v933_v0  ;;  %436 = vmatprep.subr.mxu0 %v256_v28  ;;  %v266_v57 = vld [vmem:[#allocation7 + $0x10] ss:$0 sm:$0xff]  ;;  %v268_v1 = vld [vmem:[#allocation7 + $0x20] ss:$8 sm:$0x3] }
  0x68   : > { %689 = vmatpush3.msra.mxu1 %v224_v12  ;;  %437 = vmatpush1.msra.mxu0 %v255_v29  ;;  %v269_v6 = vld [vmem:[#allocation7 + $0x30] ss:$0 sm:$0xff] }
  0x69   : > { %690 = vmatprep.subr.mxu1 %v933_v0  ;;  %438 = vmatprep.subr.mxu0 %v254_v30 }
  0x6a   : > { %691 = vmatpush3.msra.mxu1 %v223_v13  ;;  %439 = vmatpush1.msra.mxu0 %v253_v31 }
  0x6b   : > { %692 = vmatprep.subr.mxu1 %v933_v0  ;;  %440 = vmatprep.subr.mxu0 %v252_v32 }
  0x6c   : > { %693 = vmatpush3.msra.mxu1 %v222_v14  ;;  %441 = vmatpush1.msra.mxu0 %v251_v33 }
  0x6d   : > { %694 = vmatprep.subr.mxu1 %v933_v0  ;;  %442 = vmatprep.subr.mxu0 %v250_v34 }
  0x6e   : > { %695 = vmatpush3.msra.mxu1 %v221_v15  ;;  %443 = vmatpush1.msra.mxu0 %v249_v35 }
  0x6f   : > { %696 = vmatprep.subr.mxu1 %v933_v0  ;;  %444 = vmatprep.subr.mxu0 %v248_v36 }
  0x70   : > { %697 = vmatpush3.msra.mxu1 %v220_v16  ;;  %445 = vmatpush1.msra.mxu0 %v247_v37 }
  0x71   : > { %698 = vmatprep.subr.mxu1 %v933_v0  ;;  %446 = vmatprep.subr.mxu0 %v246_v38 }
  0x72   : > { %699 = vmatpush3.msra.mxu1 %v219_v17  ;;  %447 = vmatpush1.msra.mxu0 %v245_v39 }
  0x73   : > { %700 = vmatprep.subr.mxu1 %v933_v0  ;;  %448 = vmatprep.subr.mxu0 %v244_v40 }
  0x74   : > { %701 = vmatpush3.msra.mxu1 %v218_v18  ;;  %449 = vmatpush1.msra.mxu0 %v243_v41  ;;  %v420_v18 = vsub.s32 0, %v419_v63 }
  0x75   : > { %702 = vmatprep.subr.mxu1 %v933_v0  ;;  %450 = vmatprep.subr.mxu0 %v242_v42  ;;  %v424_v0 = vsub.s32 1, %v419_v63 }
  0x76   : > { %703 = vmatpush3.msra.mxu1 %v217_v19  ;;  %451 = vmatpush1.msra.mxu0 %v241_v43  ;;  %v421_v21 = vrot.slane %v268_v1, %v420_v18 }
  0x77   : > { %452 = vmatprep.subr.mxu0 %v240_v44  ;;  %v425_v2 = vrot.slane %v268_v1, %v424_v0 }
  0x78   : > { %453 = vmatpush1.msra.mxu0 %v239_v45 }
  0x79   : > { %454 = vmatprep.subr.mxu0 %v238_v46 }
  0x7a   : > { %455 = vmatpush1.msra.mxu0 %v237_v52 }
  0x7b   : > { %456 = vmatprep.subr.mxu0 %v236_v53 }
  0x7c   : > { %457 = vmatpush1.msra.mxu0 %v235_v54 }
  0x7d   : > { %458 = vmatprep.subr.mxu0 %v234_v55 }
  0x7e   : > { %459 = vmatpush1.msra.mxu0 %v233_v56 }
 0x11b   : > { %v341_v48 = vpop.f32.mrf.mxu0 }
 0x11c   : > { %v342_v49 = vadd.f32 %v341_v48, %v265_v47 }
 0x11d   : > { %v671_v50 = vpop.f32.mrf.mxu0 }
 0x11e   : > { %v345_v51 = vmax.f32 %v342_v49, 0.0 }
 0x120   : > { %705 = vmatmul.mubr.f32.vlgmr.msra.gmra.mxu1 %v345_v51 }
 0x1e0   : > { %v412_v58 = vpop.f32.mrf.mxu1 }
 0x1e1   : > { %v413_v59 = vadd.f32 %v412_v58, %v266_v57 }
 0x1e2   : > { %v706_v60 = vpop.f32.mrf.mxu1 }
 0x1e3   : > { %v416_v61 = vmax.f32 %v413_v59, 0.0 }
 0x1e5   : > { %493 = vmatmul.mubr.f32.vlgmr.msra.gmra.mxu0 %v416_v61 }
 0x2a5   : > { %v494_v3 = vpop.f32.mrf.mxu0 }
 0x2a6   : > { %v495_v25 = vadd.f32 %v494_v3, %v421_v21 }
 0x2a7   : > { %v496_v4 = vpop.f32.mrf.mxu0 }
 0x2a8   : > { %v497_v5 = vadd.f32 %v496_v4, %v425_v2 }
 0x2aa   : > { %v499_v7 = vmul.f32 2.0, %v497_v5 }
 0x2ac   : > { %v500_v8 = vsub.f32 %v269_v6, %v499_v7 }
 0x2ae   : > { %503 = vmin.xlane.f32.xlu0 %v500_v8 }
 0x337   : > { %v504_v10 = vpop.xlane.xlu0 %503 }
 0x338   : > { %vm505_vm2 = vcmp.le.f32.partialorder %v500_v8, %v504_v10 }
 0x339   : > { %v506_v11 = vsel %vm505_vm2, %v502_v9, 128 }
 0x33a   : > { %v508_v12 = vshra.s32 %v506_v11, 16  ;;  %v507_v14 = vand.u32 65535, %v506_v11 }
 0x33c   : > { %v510_v13 = vcvt.s32.f32 %v508_v12  ;;  %v509_v16 = vcvt.s32.f32 %v507_v14 }
 0x33e   : > { %511 = vmin.xlane.f32.xlu0 %v510_v13 }
 0x3c7   : > { %v512_v15 = vpop.xlane.xlu0 %511 }
 0x3c8   : > { %vm513_vm3 = vcmp.eq.f32.partialorder %v510_v13, %v512_v15  ;;  %v518_v19 = vcvt.f32.s32 %v512_v15 }
 0x3c9   : > { %v514_v17 = vsel %vm513_vm3, %v509_v16, inf }
 0x3ca   : > { %515 = vmin.xlane.f32.xlu1 %v514_v17  ;;  %v519_v22 = vshll.u32 %v518_v19, 16 }
 0x453   : > { %v516_v20 = vpop.xlane.xlu1 %515 }
 0x454   : > { %v517_v23 = vcvt.f32.s32 %v516_v20 }
 0x456   : > { %v520_v24 = vadd.s32 %v519_v22, %v517_v23 }
 0x458   : > { %v522_v26 = vcvt.s32.f32 %v520_v24 }
 0x45a   : > { %v523_v27 = vsel %vm521_vm4, %v522_v26, %v495_v25 }
 0x45b   : > { %524 = vst [vmem:[%s214_s20] sm:$0xff] %v523_v27 }
 0x45c   : > { %871 = shalt.err (!%p868_p9)
}
 0x45d   : > { %s872_s21 = scalar_lea.hbm %s1094_s29, 128  ;;  %s876_s23 = scalar_lea.hbm %s1134_s3, 256 }
 0x45e   : > { %p873_p13 = scmp.ne.s32.totalorder %s1094_s29, %s872_s21  ;;  %p877_p4 = scmp.lt.s32.totalorder %s1094_s29, %s1134_s3 }
 0x45f   : > { %p878_p8 = scmp.lt.s32.totalorder %s876_s23, %s872_s21 }
 0x460   : > { %p874_p5 = pnand %p873_p13, %p1150_p0 }
 0x461   : > { %p879_p3 = por %p878_p8, %p877_p4 }
 0x462   : > { %p875_p10 = pneg %p874_p5 }
 0x464   : > { %p880_p11 = pnand %p879_p3, %p875_p10 }
 0x466   : > { %883 = shalt.err (!%p880_p11)
}
 0x467   : > { %717 = dma.vmem_to_hbm [thread:$0]  (%p1150_p0), %s540_s25, 128, %s1094_s29, %s526_s5  }
 0x468 PF: > { %s551_s30 = sand.u32 1, %s914_s12   ;;  %p1151_p1 = scmp.ne.s32.totalorder %s1140_s19, 0 }
 0x469   : > { %p1152_p2 = scmp.ge.s32.totalorder %s926_s15, 2  ;;  %s552_s4 = scalar_lea.sflag [#allocation4], %s551_s30 }
 0x46b   : > { %p731_p6 = pnand %p1152_p2, %p1151_p1 }
 0x46d   : > { %p732_p12 = pneg %p731_p6 }
 0x46f   : > { %909 = dma.done.wait (%p732_p12), %s552_s4, 128  }
 0x470   : > { %911 = vsyncadd (%p732_p12), %s552_s4, 4294967168  ;;  %p17_p7 = scmp.ge.s32.totalorder %s1028_s7, 4   ;;  %s1153_s12 = smov %s918_s13 }
 0x471   : > { %s1154_s13 = smov %s922_s14  ;;  %s1155_s14 = smov %s1044_s11 }
 0x472   : > { %s1156_s15 = smov %s1028_s7  ;;  %19 = sbr.rel (!%p17_p7) target bundleno = 6 (0x6), region = 86 }
 0x477   :  { %557 = vsyncpa [#allocation3], 1 }
 0x478   :  { %559 = vsyncpa [#allocation3 + $0x1], 1 }
 0x479   :  { %560 = vsyncpa [#allocation6], 1 }
 0x47a   :  { %561 = vsyncpa [#allocation4], 1 }
 0x47b   :  { %563 = vsyncpa [#allocation4 + $0x1], 1 }

</bundles_post_ra>
